<compile_context>
chip_gen: v7x
topology: tpu7x:2x2x1
jax: 0.10.0
libtpu: 0.0.40
codegen_flags: <defaults>
</compile_context>

<pallas_src>
import functools

import jax
import jax.numpy as jnp
from jax.experimental import pallas as pl
from jax.experimental.pallas import tpu as pltpu


def _round_up(x: int, m: int) -> int:
    return ((x + m - 1) // m) * m


def _fused_kernel(x_ref, wr_ref, b1_ref, w3s_ref, b3_ref, out_ref):
    """One batch block.

    x_ref   : (BB, F)  activations, F = S*D (features on lanes, batch on sublanes)
    wr_ref  : (3, F)   relu(W1) re-laid-out so row c multiplies x elementwise
    b1_ref  : (1, F)   bias1 (repeated to F)
    w3s_ref : (F, O)   W3 (column-repeated, transposed) with 1/(3D) folded in
    b3_ref  : (1, O)
    out_ref : (BB, O)
    """
    x = x_ref[...]                     # (BB, F)
    b1 = b1_ref[...]                   # (1, F) -> broadcasts over batch rows
    wr = wr_ref[...]                   # (3, F)

    # mean over the 3x-replicated (permuted) dim, pushed before the matmul:
    #   t[b, j] = sum_c relu( relu(W1)_c[j] * x[b, j] + b1[j] )
    t = jnp.maximum(wr[0:1, :] * x + b1, 0.0)
    t = t + jnp.maximum(wr[1:2, :] * x + b1, 0.0)
    t = t + jnp.maximum(wr[2:3, :] * x + b1, 0.0)

    # single lane-contracting dot per block; 1/(3D) already folded into w3s.
    out_ref[...] = (
        jnp.dot(t, w3s_ref[...], preferred_element_type=jnp.float32)
        + b3_ref[...]
    )


@functools.partial(jax.jit, static_argnames=("block_b",))
def model_forward(x1, w1, b1, w3, b3, *, block_b=None):
    """x1: (B, S, D); w1: (3D, S); b1: (S,); w3: (O, S); b3: (O,).

    Repaired-module consistency requires S == 3*D (see header TODO).
    """
    B, S, D = x1.shape
    K = 3 * D                      # replication factor from cat([x1]*3, -1)
    F = S * D
    O = w3.shape[0]
    assert w1.shape == (K, S) and b1.shape == (S,)
    assert w3.shape[1] == S and b3.shape == (O,)

    # ---- tiny weight-side prep, hoisted out of the kernel (done once) ----
    w1r = jax.nn.relu(w1)                                          # hoisted relu(W1)
    # wr[c, s*D + d] = relu(W1)[c*D + d, s]  (folds the permute into W1)
    wr = jnp.transpose(w1r.reshape(3, D, S), (0, 2, 1)).reshape(3, F)
    b1e = jnp.repeat(b1, D).reshape(1, F)
    # mean over the 3D replicated rows folded into the second matmul weight
    w3s = (jnp.repeat(w3, D, axis=1).T / float(K)).astype(jnp.float32)   # (F, O)
    b3r = b3.reshape(1, O)

    # ---- activation path: no concat, no transpose — just a free reshape ----
    x2 = x1.reshape(B, F).astype(jnp.float32)

    # ---- batch blocking: many rows per grid step, 8-aligned sublanes ----
    if block_b is None:
        cap = 4096                                   # ~amortizes 0.35 us/step
        n_blocks = pl.cdiv(B, cap)
        block_b = _round_up(pl.cdiv(B, n_blocks), 8)
    else:
        block_b = _round_up(block_b, 8)
    b_pad = _round_up(B, block_b)
    if b_pad != B:
        x2 = jnp.pad(x2, ((0, b_pad - B), (0, 0)))   # padded rows are sliced off
    grid = (b_pad // block_b,)

    out = pl.pallas_call(
        _fused_kernel,
        out_shape=jax.ShapeDtypeStruct((b_pad, O), jnp.float32),
        grid=grid,
        in_specs=[
            pl.BlockSpec((block_b, F), lambda i: (i, 0)),   # activations (batched block)
            pl.BlockSpec((3, F), lambda i: (0, 0)),         # relu(W1) re-layout (full)
            pl.BlockSpec((1, F), lambda i: (0, 0)),         # bias1 row (full)
            pl.BlockSpec((F, O), lambda i: (0, 0)),         # W3^T * 1/(3D) (full)
            pl.BlockSpec((1, O), lambda i: (0, 0)),         # bias3 row (full)
        ],
        # lane-dense-ish (BB, O) output blocks; second-last dim is 8-aligned.
        # (If O stays tiny and B is huge, an (O, B) layout would be fully
        #  lane-dense, at the cost of a transposed output convention.)
        out_specs=pl.BlockSpec((block_b, O), lambda i: (i, 0)),
        compiler_params=pltpu.CompilerParams(
            dimension_semantics=("parallel",),       # shard batch blocks across TCs
            vmem_limit_bytes=32 * 1024 * 1024,       # safe on v5e/v6e/v7x
        ),
    )(x2, wr, b1e, w3s, b3r)
    return out[:B]


if __name__ == "__main__":
    key = jax.random.PRNGKey(0)
    k1, k2, k3, k4, k5 = jax.random.split(key, 5)

    # Small shapes consistent with the (repaired) module: S = 3*D.
    B, S, D = 20, 3, 1
    in1 = out1 = 3          # first linear (see header TODO)
    in3 = out3 = 3          # linear3 = Linear(3, 3) as declared

    x1 = jax.random.normal(k1, (B, S, D), dtype=jnp.float32)

    # Deterministic nn.Linear-style init: U(-1/sqrt(in), 1/sqrt(in)).
    bnd1 = float(1.0 / (in1 ** 0.5))
    w1 = jax.random.uniform(k2, (out1, in1), minval=-bnd1, maxval=bnd1, dtype=jnp.float32)
    b1 = jax.random.uniform(k3, (out1,), minval=-bnd1, maxval=bnd1, dtype=jnp.float32)
    bnd3 = float(1.0 / (in3 ** 0.5))
    w3 = jax.random.uniform(k4, (out3, in3), minval=-bnd3, maxval=bnd3, dtype=jnp.float32)
    b3 = jax.random.uniform(k5, (out3,), minval=-bnd3, maxval=bnd3, dtype=jnp.float32)

    out = model_forward(x1, w1, b1, w3, b3)
    jax.block_until_ready(out)

    # Pure-JAX reference of the same (repaired) graph.
    v1 = jnp.concatenate([x1, x1, x1], axis=-1)
    v2 = jnp.transpose(v1, (0, 2, 1))
    v22 = jax.nn.relu(w1) * v2 + b1
    ref = jnp.mean(jax.nn.relu(v22) @ w3.T + b3, axis=-2)

    assert out.shape == (B, out3), out.shape
    assert jnp.allclose(out, ref, atol=1e-5, rtol=1e-5), (out, ref)

    print("KERNEL_OK")
</pallas_src>

<mosaic_0001>
module attributes {stable_mosaic.version = 11 : i64} {
  func.func @_fused_kernel(%arg0: i32, %arg1: memref<24x3xf32, #tpu.memory_space<vmem>>, %arg2: memref<3x3xf32, #tpu.memory_space<vmem>>, %arg3: memref<1x3xf32, #tpu.memory_space<vmem>>, %arg4: memref<3x3xf32, #tpu.memory_space<vmem>>, %arg5: memref<1x3xf32, #tpu.memory_space<vmem>>, %arg6: memref<24x3xf32, #tpu.memory_space<vmem>>) attributes {dimension_semantics = [#tpu.dimension_semantics<parallel>], iteration_bounds = array<i64: 1>, scalar_prefetch = 0 : i64, scratch_operands = 0 : i64, tpu.core_type = #tpu.core_type<tc>, window_params = [{transform_indices = @transform_0, window_bounds = array<i64: 24, 3>}, {pipeline_mode = #tpu.pipeline_mode<synchronous>, transform_indices = @transform_1, window_bounds = array<i64: 3, 3>}, {pipeline_mode = #tpu.pipeline_mode<synchronous>, transform_indices = @transform_2, window_bounds = array<i64: 1, 3>}, {pipeline_mode = #tpu.pipeline_mode<synchronous>, transform_indices = @transform_3, window_bounds = array<i64: 3, 3>}, {pipeline_mode = #tpu.pipeline_mode<synchronous>, transform_indices = @transform_4, window_bounds = array<i64: 1, 3>}, {transform_indices = @transform_5, window_bounds = array<i64: 24, 3>}]} {
    %c0 = arith.constant 0 : index
    %c0_0 = arith.constant 0 : index
    %0 = vector.load %arg1[%c0, %c0_0] : memref<24x3xf32, #tpu.memory_space<vmem>>, vector<24x3xf32>
    %c0_1 = arith.constant 0 : index
    %c0_2 = arith.constant 0 : index
    %1 = vector.load %arg3[%c0_1, %c0_2] : memref<1x3xf32, #tpu.memory_space<vmem>>, vector<1x3xf32>
    %c0_3 = arith.constant 0 : index
    %c0_4 = arith.constant 0 : index
    %2 = vector.load %arg2[%c0_3, %c0_4] : memref<3x3xf32, #tpu.memory_space<vmem>>, vector<3x3xf32>
    %3 = vector.extract_strided_slice %2 {offsets = [0, 0], sizes = [1, 3], strides = [1, 1]} : vector<3x3xf32> to vector<1x3xf32>
    %4 = vector.broadcast %3 : vector<1x3xf32> to vector<24x3xf32>
    %5 = arith.mulf %4, %0 : vector<24x3xf32>
    %6 = vector.broadcast %1 : vector<1x3xf32> to vector<24x3xf32>
    %7 = arith.addf %5, %6 : vector<24x3xf32>
    %cst = arith.constant 0.000000e+00 : f32
    %8 = vector.broadcast %cst : f32 to vector<24x3xf32>
    %9 = arith.maximumf %7, %8 : vector<24x3xf32>
    %10 = vector.extract_strided_slice %2 {offsets = [1, 0], sizes = [1, 3], strides = [1, 1]} : vector<3x3xf32> to vector<1x3xf32>
    %11 = vector.broadcast %10 : vector<1x3xf32> to vector<24x3xf32>
    %12 = arith.mulf %11, %0 : vector<24x3xf32>
    %13 = vector.broadcast %1 : vector<1x3xf32> to vector<24x3xf32>
    %14 = arith.addf %12, %13 : vector<24x3xf32>
    %cst_5 = arith.constant 0.000000e+00 : f32
    %15 = vector.broadcast %cst_5 : f32 to vector<24x3xf32>
    %16 = arith.maximumf %14, %15 : vector<24x3xf32>
    %17 = arith.addf %9, %16 : vector<24x3xf32>
    %18 = vector.extract_strided_slice %2 {offsets = [2, 0], sizes = [1, 3], strides = [1, 1]} : vector<3x3xf32> to vector<1x3xf32>
    %19 = vector.broadcast %18 : vector<1x3xf32> to vector<24x3xf32>
    %20 = arith.mulf %19, %0 : vector<24x3xf32>
    %21 = vector.broadcast %1 : vector<1x3xf32> to vector<24x3xf32>
    %22 = arith.addf %20, %21 : vector<24x3xf32>
    %cst_6 = arith.constant 0.000000e+00 : f32
    %23 = vector.broadcast %cst_6 : f32 to vector<24x3xf32>
    %24 = arith.maximumf %22, %23 : vector<24x3xf32>
    %25 = arith.addf %17, %24 : vector<24x3xf32>
    %c0_7 = arith.constant 0 : index
    %c0_8 = arith.constant 0 : index
    %26 = vector.load %arg4[%c0_7, %c0_8] : memref<3x3xf32, #tpu.memory_space<vmem>>, vector<3x3xf32>
    %cst_9 = arith.constant dense<0.000000e+00> : vector<24x3xf32>
    %27 = tpu.matmul %25, %26, %cst_9 {dimension_numbers = #tpu.dot_dimension_numbers<[1], [0], [0], [1], [0, 0, 1, 1], [], []>} : vector<24x3xf32>, vector<3x3xf32>, vector<24x3xf32> -> vector<24x3xf32>
    %c0_10 = arith.constant 0 : index
    %c0_11 = arith.constant 0 : index
    %28 = vector.load %arg5[%c0_10, %c0_11] : memref<1x3xf32, #tpu.memory_space<vmem>>, vector<1x3xf32>
    %29 = vector.broadcast %28 : vector<1x3xf32> to vector<24x3xf32>
    %30 = arith.addf %27, %29 : vector<24x3xf32>
    %c0_12 = arith.constant 0 : index
    %c0_13 = arith.constant 0 : index
    %31 = vector.load %arg6[%c0_12, %c0_13] : memref<24x3xf32, #tpu.memory_space<vmem>>, vector<24x3xf32>
    tpu.vector_store %arg6[%c0_12, %c0_13], %30 {strides = array<i32>} : memref<24x3xf32, #tpu.memory_space<vmem>>, vector<24x3xf32>,
    return
  }
  func.func @transform_0(%arg0: i32) -> (i32, i32) {
    %c0_i32 = arith.constant 0 : i32
    %c0_i32_0 = arith.constant 0 : i32
    return %arg0, %c0_i32 : i32, i32
  }
  func.func @transform_1(%arg0: i32) -> (i32, i32) {
    %c0_i32 = arith.constant 0 : i32
    %c0_i32_0 = arith.constant 0 : i32
    %c0_i32_1 = arith.constant 0 : i32
    return %c0_i32, %c0_i32_0 : i32, i32
  }
  func.func @transform_2(%arg0: i32) -> (i32, i32) {
    %c0_i32 = arith.constant 0 : i32
    %c0_i32_0 = arith.constant 0 : i32
    %c0_i32_1 = arith.constant 0 : i32
    return %c0_i32, %c0_i32_0 : i32, i32
  }
  func.func @transform_3(%arg0: i32) -> (i32, i32) {
    %c0_i32 = arith.constant 0 : i32
    %c0_i32_0 = arith.constant 0 : i32
    %c0_i32_1 = arith.constant 0 : i32
    return %c0_i32, %c0_i32_0 : i32, i32
  }
  func.func @transform_4(%arg0: i32) -> (i32, i32) {
    %c0_i32 = arith.constant 0 : i32
    %c0_i32_0 = arith.constant 0 : i32
    %c0_i32_1 = arith.constant 0 : i32
    return %c0_i32, %c0_i32_0 : i32, i32
  }
  func.func @transform_5(%arg0: i32) -> (i32, i32) {
    %c0_i32 = arith.constant 0 : i32
    %c0_i32_0 = arith.constant 0 : i32
    return %arg0, %c0_i32 : i32, i32
  }
}

</mosaic_0001>

<bundles_post_ra>
// kernel: model_forward.1
= control target key start
LH: loop header
LB: loop body
LE: loop exit
PB: predicated region body
PF: predicated region fallthrough
CT: control target
= control target key end

     0   :  { %vm94_vm0 = vcmask 1042432   ;;  %v25_v0 = vlaneseq  ;;  %v210_v1 = vmov 0.0   ;;  %vm211_vm1 = vmmov 0   ;;  %s281_s3 = inlined_call_operand.vmem [shape: f32[3,3], index: 3, kind: input, shape index: {}]   ;;  %s282_s1 = inlined_call_operand.vmem [shape: f32[3,3], index: 1, kind: input, shape index: {}]   ;;  %s283_s0 = inlined_call_operand.vmem [shape: f32[24,3], index: 0, kind: input, shape index: {}]   ;;  %s284_s2 = inlined_call_operand.vmem [shape: f32[1,3], index: 2, kind: input, shape index: {}]   ;;  %s285_s4 = inlined_call_operand.vmem [shape: f32[1,3], index: 4, kind: input, shape index: {}]   ;;  %s286_s5 = inlined_call_operand.vmem [shape: f32[24,3], index: 5, kind: output, shape index: {}]  }
   0x1   :  { %206 = vmatprep.subr.mxu1 %v210_v1  ;;  %v76_v2 = vld [vmem:[%s281_s3] sm:$0x7]  ;;  %200 = vmatprep.mubr.msk.f32.mxu1 %vm211_vm1, %v210_v1  ;;  %v21_v8 = vld [vmem:[%s283_s0 + $0x8] sm:$0xff]  ;;  %v22_v13 = vld [vmem:[%s283_s0 + $0x10] sm:$0xff]  ;;  %vm84_vm2 = vcmask 23552  }
   0x2   :  { %207 = vmatpush3.msk.msra.mxu1 %vm94_vm0, %v76_v2  ;;  %v26_v3 = vshrl.u32 %v25_v0, 7  ;;  %195 = vmatprep.subr.mxu0 %v210_v1  ;;  %v24_v4 = vld [vmem:[%s282_s1] sm:$0x7] }
   0x3   :  { %196 = vmatpush3.msk.msra.mxu0 %vm94_vm0, %v76_v2  ;;  %197 = vmatprep.mubr.msk.f32.mxu0 %vm211_vm1, %v210_v1  ;;  %v20_v9 = vld [vmem:[%s283_s0] sm:$0xff] }
   0x4   :  { %v27_v5 = vsub.s32 0, %v26_v3  ;;  %v46_v6 = vsub.s32 1, %v26_v3  ;;  %v62_v7 = vsub.s32 2, %v26_v3  ;;  %v185_v14 = vld [vmem:[%s284_s2] ss:$0 sm:$0xff] }
   0x5   :  { %v186_v48 = vld [vmem:[%s285_s4] ss:$0 sm:$0xff] }
   0x6   :  { %v28_v10 = vrot.slane %v24_v4, %v27_v5  ;;  %v47_v11 = vrot.slane %v24_v4, %v46_v6  ;;  %v63_v12 = vrot.slane %v24_v4, %v62_v7 }
   0x8   :  { %v30_v15 = vmul.f32 %v28_v10, %v21_v8  ;;  %v49_v16 = vmul.f32 %v47_v11, %v21_v8  ;;  %v65_v17 = vmul.f32 %v63_v12, %v21_v8  ;;  %v29_v18 = vmul.f32 %v28_v10, %v20_v9 }
   0x9   :  { %v48_v19 = vmul.f32 %v47_v11, %v20_v9  ;;  %v64_v20 = vmul.f32 %v63_v12, %v20_v9  ;;  %v31_v21 = vmul.f32 %v28_v10, %v22_v13  ;;  %v50_v22 = vmul.f32 %v47_v11, %v22_v13 }
   0xa   :  { %v39_v23 = vadd.f32 %v185_v14, %v30_v15  ;;  %v52_v24 = vadd.f32 %v185_v14, %v49_v16  ;;  %v68_v25 = vadd.f32 %v185_v14, %v65_v17  ;;  %v38_v26 = vadd.f32 %v185_v14, %v29_v18 }
   0xb   :  { %v51_v27 = vadd.f32 %v185_v14, %v48_v19  ;;  %v67_v28 = vadd.f32 %v185_v14, %v64_v20  ;;  %v40_v29 = vadd.f32 %v185_v14, %v31_v21  ;;  %v53_v30 = vadd.f32 %v185_v14, %v50_v22 }
   0xc   :  { %v42_v31 = vmax.f32 %v39_v23, 0.0  ;;  %v55_v32 = vmax.f32 %v52_v24, 0.0  ;;  %v71_v33 = vmax.f32 %v68_v25, 0.0  ;;  %v41_v34 = vmax.f32 %v38_v26, 0.0 }
   0xd   :  { %v54_v35 = vmax.f32 %v51_v27, 0.0  ;;  %v70_v36 = vmax.f32 %v67_v28, 0.0  ;;  %v43_v37 = vmax.f32 %v40_v29, 0.0  ;;  %v56_v38 = vmax.f32 %v53_v30, 0.0 }
   0xe   :  { %v58_v39 = vadd.f32 %v55_v32, %v42_v31  ;;  %v66_v40 = vmul.f32 %v63_v12, %v22_v13 }
   0xf   :  { %v57_v41 = vadd.f32 %v54_v35, %v41_v34  ;;  %v59_v43 = vadd.f32 %v56_v38, %v43_v37 }
  0x10   :  { %v74_v42 = vadd.f32 %v71_v33, %v58_v39  ;;  %v69_v44 = vadd.f32 %v185_v14, %v66_v40 }
  0x11   :  { %v73_v45 = vadd.f32 %v70_v36, %v57_v41 }
  0x12   :  { %201 = vmatmul.mubr.msk.f32.vlgmr.msra.gmra.mrb[0].mxu1 %vm84_vm2, %v74_v42  ;;  %v72_v46 = vmax.f32 %v69_v44, 0.0 }
  0x13   :  { %198 = vmatmul.mubr.msk.f32.vlgmr.msra.gmra.mrb[0].mxu0 %vm84_vm2, %v73_v45  ;;  %203 = vmatprep.mubr.msk.f32.mxu1 %vm211_vm1, %v210_v1 }
  0x14   :  { %v75_v47 = vadd.f32 %v72_v46, %v59_v43 }
  0x16   :  { %204 = vmatmul.mubr.msk.f32.gmra.mrb[2].mxu1 %vm84_vm2, %v75_v47 }
  0xe5   :  { %v169_v49 = vpop.f32.mrb[0].mxu1 }
  0xe6   :  { %v170_v50 = vadd.f32 %v186_v48, %v169_v49  ;;  %v202_v51 = vpop.f32.mrb[1].mxu1  ;;  %v164_v52 = vpop.f32.mrb[0].mxu0 }
  0xe7   :  { %v165_v53 = vadd.f32 %v186_v48, %v164_v52  ;;  %v199_v54 = vpop.f32.mrb[1].mxu0 }
  0xe8   :  { %179 = vst.msk [vmem:[%s286_s5 + $0x8] sm:$0xff] %vm84_vm2, %v170_v50 }
  0xe9   :  { %178 = vst.msk [vmem:[%s286_s5] sm:$0xff] %vm84_vm2, %v165_v53  ;;  %v174_v55 = vpop.f32.mrb[2].mxu1 }
  0xea   :  { %v175_v56 = vadd.f32 %v186_v48, %v174_v55  ;;  %v205_v57 = vpop.f32.mrb[3].mxu1 }
  0xec   :  { %180 = vst.msk [vmem:[%s286_s5 + $0x10] sm:$0xff] %vm84_vm2, %v175_v56 }

</bundles_post_ra>
